<compile_context>
chip_gen: v6e
topology: v6e:2x2x1
jax: 0.10.0
libtpu: 0.0.40
codegen_flags: <defaults>
</compile_context>

<pallas_src>
import jax
import jax.numpy as jnp
from jax import lax
from jax.experimental import pallas as pl
from jax.experimental.pallas import tpu as pltpu


# ---------------------------------------------------------------------------
# Kernel 1: Tower MLP (Linear -> ReLU -> Linear), batch-tiled, weights resident
# ---------------------------------------------------------------------------
def tower_kernel(x_ref, w1_ref, b1_ref, w2_ref, b2_ref, out_ref):
    # x: [TB, D_in] bf16, w1: [D_in, H] bf16, b1: [1, H] f32,
    # w2: [H, D_out] bf16, b2: [1, D_out] f32, out: [TB, D_out] bf16.
    # NOTE: the f32 intermediate h is TB*H*4 bytes of VMEM -- budget it when
    # raising tb (prefer tb=512 over 1024 if H grows, esp. on v7x).
    h = jnp.dot(x_ref[...], w1_ref[...], preferred_element_type=jnp.float32)
    h = jnp.maximum(h + b1_ref[...], 0.0)            # f32 VPU ops (v5e-safe)
    e = jnp.dot(h.astype(jnp.bfloat16), w2_ref[...],
                preferred_element_type=jnp.float32)
    out_ref[...] = (e + b2_ref[...]).astype(out_ref.dtype)


# ---------------------------------------------------------------------------
# Kernel 2: score matmul  user_emb @ item_emb^T  as a (1,1)-contraction
# ---------------------------------------------------------------------------
def score_kernel(u_ref, i_ref, out_ref):
    s = lax.dot_general(
        u_ref[...], i_ref[...],
        dimension_numbers=(((1,), (1,)), ((), ())),   # contract feature dims (NT matmul)
        preferred_element_type=jnp.float32)
    out_ref[...] = s.astype(out_ref.dtype)


# ---------------------------------------------------------------------------
# Wrappers
# ---------------------------------------------------------------------------
def _clamp_tile(tile, dim):
    # Full-extent blocks are always legal; otherwise keep the requested tile
    # and let pl.cdiv handle any ragged trailing block (masked by Pallas).
    return dim if dim < tile else tile


def tower_forward(x, params, *, tb=512, vmem_limit_bytes=None):
    """x: [B, D_in] bf16 gathered id-embeddings -> [B, D_out] bf16 tower output."""
    if x.dtype != jnp.bfloat16:        # tables are stored bf16, so normally a no-op
        x = x.astype(jnp.bfloat16)
    B, D_in = x.shape
    H = params["w1"].shape[1]
    D_out = params["w2"].shape[1]
    tb = _clamp_tile(tb, B)
    grid = (pl.cdiv(B, tb),)

    cost = pl.CostEstimate(
        flops=2 * B * (D_in * H + H * D_out),
        transcendentals=0,
        bytes_accessed=(x.size * 2
                        + params["w1"].size * 2 + params["w2"].size * 2
                        + params["b1"].size * 4 + params["b2"].size * 4
                        + B * D_out * 2))

    return pl.pallas_call(
        tower_kernel,
        out_shape=jax.ShapeDtypeStruct((B, D_out), jnp.bfloat16),
        grid_spec=pltpu.PrefetchScalarGridSpec(
            num_scalar_prefetch=0,
            grid=grid,
            in_specs=[
                pl.BlockSpec((tb, D_in), lambda i: (i, 0)),   # batch tile (varies)
                pl.BlockSpec((D_in, H), lambda i: (0, 0)),    # weights resident
                pl.BlockSpec((1, H), lambda i: (0, 0)),
                pl.BlockSpec((H, D_out), lambda i: (0, 0)),
                pl.BlockSpec((1, D_out), lambda i: (0, 0)),
            ],
            out_specs=pl.BlockSpec((tb, D_out), lambda i: (i, 0)),
        ),
        compiler_params=pltpu.CompilerParams(
            dimension_semantics=("parallel",),
            vmem_limit_bytes=vmem_limit_bytes),
        cost_estimate=cost,
    )(x, params["w1"], params["b1"], params["w2"], params["b2"])


def score_forward(user_emb, item_emb, *, tm=256, tn=256,
                  out_dtype=jnp.float32, vmem_limit_bytes=None):
    """user_emb: [Bu, D] bf16, item_emb: [Bi, D] bf16 -> scores [Bu, Bi] out_dtype."""
    Bu, D = user_emb.shape
    Bi, _ = item_emb.shape
    tm = _clamp_tile(tm, Bu)
    tn = _clamp_tile(tn, Bi)
    grid = (pl.cdiv(Bu, tm), pl.cdiv(Bi, tn))
    out_bytes = jnp.dtype(out_dtype).itemsize

    cost = pl.CostEstimate(
        flops=2 * Bu * Bi * D,
        transcendentals=0,
        # user tile fetched once per grid row; item tile re-fetched per (i,j).
        bytes_accessed=(Bu * D * 2 + grid[0] * Bi * D * 2 + Bu * Bi * out_bytes))

    return pl.pallas_call(
        score_kernel,
        out_shape=jax.ShapeDtypeStruct((Bu, Bi), out_dtype),
        grid_spec=pltpu.PrefetchScalarGridSpec(
            num_scalar_prefetch=0,
            grid=grid,
            in_specs=[
                pl.BlockSpec((tm, D), lambda i, j: (i, 0)),
                pl.BlockSpec((tn, D), lambda i, j: (j, 0)),
            ],
            out_specs=pl.BlockSpec((tm, tn), lambda i, j: (i, j)),
        ),
        compiler_params=pltpu.CompilerParams(
            dimension_semantics=("parallel", "parallel"),
            vmem_limit_bytes=vmem_limit_bytes),
        cost_estimate=cost,
    )(user_emb, item_emb)


def recommender_forward(user_vecs, item_vecs, user_params, item_params,
                        *, tb=512, tm=256, tn=256, out_dtype=jnp.float32):
    user_emb = tower_forward(user_vecs, user_params, tb=tb)   # [Bu, D_out] bf16
    item_emb = tower_forward(item_vecs, item_params, tb=tb)   # [Bi, D_out] bf16
    return score_forward(user_emb, item_emb, tm=tm, tn=tn,
                         out_dtype=out_dtype)                 # [Bu, Bi]


# ---------------------------------------------------------------------------
# Deterministic parameter / input construction (glue)
# ---------------------------------------------------------------------------
def make_tower_params(key, d_emb, d_hidden, d_out):
    # MXU operands (weights) stored bf16; biases (VPU side) stay f32.
    k1, k2, k3, k4 = jax.random.split(key, 4)
    return {
        "w1": (jax.random.normal(k1, (d_emb, d_hidden), jnp.float32) * 0.1
               ).astype(jnp.bfloat16),
        "b1": jax.random.normal(k2, (1, d_hidden), jnp.float32) * 0.1,
        "w2": (jax.random.normal(k3, (d_hidden, d_out), jnp.float32) * 0.1
               ).astype(jnp.bfloat16),
        "b2": jax.random.normal(k4, (1, d_out), jnp.float32) * 0.1,
    }


def reference_forward(user_vecs, item_vecs, up, ip):
    # Pure-JAX reference of the same (bf16-operand, f32-accumulate) math.
    def tower(x, p):
        h = jnp.dot(x.astype(jnp.bfloat16), p["w1"],
                    preferred_element_type=jnp.float32) + p["b1"]
        h = jnp.maximum(h, 0.0).astype(jnp.bfloat16)
        e = jnp.dot(h, p["w2"], preferred_element_type=jnp.float32) + p["b2"]
        return e.astype(jnp.bfloat16)

    ue = tower(user_vecs, up)
    ie = tower(item_vecs, ip)
    return lax.dot_general(ue, ie, dimension_numbers=(((1,), (1,)), ((), ())),
                           preferred_element_type=jnp.float32)


if __name__ == "__main__":
    key = jax.random.PRNGKey(0)
    k_ut, k_it, k_ue, k_ie, k_uid, k_iid = jax.random.split(key, 6)

    # Small but hardware-aligned shapes: feature dims = 128 lanes; batches
    # sized so the score grid is 2x2 at the default tm=tn=256 tiles (>=2 steps
    # per 'parallel' axis for v7x megacore). Tower grid is 1 step at tb=512.
    num_users, num_items = 64, 64          # embedding-table rows
    d_emb, d_hidden, d_out = 128, 128, 128
    batch_users, batch_items = 512, 512    # training mode: item batch from item_inputs

    # Embedding tables (the Tower's nn.Embedding weights) stored bf16 at the
    # source: the gather output is already MXU-ready, no wrapper cast pass.
    user_table = (jax.random.normal(k_ue, (num_users, d_emb), jnp.float32) * 0.1
                  ).astype(jnp.bfloat16)
    item_table = (jax.random.normal(k_ie, (num_items, d_emb), jnp.float32) * 0.1
                  ).astype(jnp.bfloat16)

    # Tower MLP parameters.
    user_params = make_tower_params(k_ut, d_emb, d_hidden, d_out)
    item_params = make_tower_params(k_it, d_emb, d_hidden, d_out)

    # Integer id inputs, as in user_inputs['user_id'] / item_inputs['item_id'].
    user_ids = jax.random.randint(k_uid, (batch_users,), 0, num_users)
    item_ids = jax.random.randint(k_iid, (batch_items,), 0, num_items)

    # TODO(synk): at production table sizes, fold this gather into the tower
    # kernel via PrefetchScalarGridSpec + pl.Element row-gather so gathered
    # vectors never round-trip HBM; kept as glue at demo sizes.
    user_vecs = jnp.take(user_table, user_ids, axis=0)   # [Bu, d_emb] bf16
    item_vecs = jnp.take(item_table, item_ids, axis=0)   # [Bi, d_emb] bf16

    scores = recommender_forward(user_vecs, item_vecs, user_params, item_params)
    scores = jax.block_until_ready(scores)

    # Correctness check against a pure-JAX reference of the same math
    # (bf16 MXU operands, f32 accumulation), loose tolerance for rounding/order.
    ref = reference_forward(user_vecs, item_vecs, user_params, item_params)
    assert scores.shape == (batch_users, batch_items)
    max_err = float(jnp.max(jnp.abs(scores - ref)))
    assert jnp.allclose(scores, ref, atol=2e-2, rtol=2e-2), max_err

    print("KERNEL_OK")
</pallas_src>

<mosaic_0001>
module attributes {stable_mosaic.version = 11 : i64} {
  func.func @tower_kernel(%arg0: i32, %arg1: memref<512x128xbf16, #tpu.memory_space<vmem>>, %arg2: memref<128x128xbf16, #tpu.memory_space<vmem>>, %arg3: memref<1x128xf32, #tpu.memory_space<vmem>>, %arg4: memref<128x128xbf16, #tpu.memory_space<vmem>>, %arg5: memref<1x128xf32, #tpu.memory_space<vmem>>, %arg6: memref<512x128xbf16, #tpu.memory_space<vmem>>) attributes {dimension_semantics = [#tpu.dimension_semantics<parallel>], iteration_bounds = array<i64: 1>, scalar_prefetch = 0 : i64, scratch_operands = 0 : i64, tpu.core_type = #tpu.core_type<tc>, window_params = [{transform_indices = @transform_0, window_bounds = array<i64: 512, 128>}, {pipeline_mode = #tpu.pipeline_mode<synchronous>, transform_indices = @transform_1, window_bounds = array<i64: 128, 128>}, {pipeline_mode = #tpu.pipeline_mode<synchronous>, transform_indices = @transform_2, window_bounds = array<i64: 1, 128>}, {pipeline_mode = #tpu.pipeline_mode<synchronous>, transform_indices = @transform_3, window_bounds = array<i64: 128, 128>}, {pipeline_mode = #tpu.pipeline_mode<synchronous>, transform_indices = @transform_4, window_bounds = array<i64: 1, 128>}, {transform_indices = @transform_5, window_bounds = array<i64: 512, 128>}]} {
    %c0 = arith.constant 0 : index
    %c0_0 = arith.constant 0 : index
    %0 = vector.load %arg1[%c0, %c0_0] : memref<512x128xbf16, #tpu.memory_space<vmem>>, vector<512x128xbf16>
    %c0_1 = arith.constant 0 : index
    %c0_2 = arith.constant 0 : index
    %1 = vector.load %arg2[%c0_1, %c0_2] : memref<128x128xbf16, #tpu.memory_space<vmem>>, vector<128x128xbf16>
    %cst = arith.constant dense<0.000000e+00> : vector<512x128xf32>
    %2 = tpu.matmul %0, %1, %cst {dimension_numbers = #tpu.dot_dimension_numbers<[1], [0], [0], [1], [0, 0, 1, 1], [], []>} : vector<512x128xbf16>, vector<128x128xbf16>, vector<512x128xf32> -> vector<512x128xf32>
    %c0_3 = arith.constant 0 : index
    %c0_4 = arith.constant 0 : index
    %3 = vector.load %arg3[%c0_3, %c0_4] : memref<1x128xf32, #tpu.memory_space<vmem>>, vector<1x128xf32>
    %4 = vector.broadcast %3 : vector<1x128xf32> to vector<512x128xf32>
    %5 = arith.addf %2, %4 : vector<512x128xf32>
    %cst_5 = arith.constant 0.000000e+00 : f32
    %6 = vector.broadcast %cst_5 : f32 to vector<512x128xf32>
    %7 = arith.maximumf %5, %6 : vector<512x128xf32>
    %8 = arith.truncf %7 : vector<512x128xf32> to vector<512x128xbf16>
    %c0_6 = arith.constant 0 : index
    %c0_7 = arith.constant 0 : index
    %9 = vector.load %arg4[%c0_6, %c0_7] : memref<128x128xbf16, #tpu.memory_space<vmem>>, vector<128x128xbf16>
    %cst_8 = arith.constant dense<0.000000e+00> : vector<512x128xf32>
    %10 = tpu.matmul %8, %9, %cst_8 {dimension_numbers = #tpu.dot_dimension_numbers<[1], [0], [0], [1], [0, 0, 1, 1], [], []>} : vector<512x128xbf16>, vector<128x128xbf16>, vector<512x128xf32> -> vector<512x128xf32>
    %c0_9 = arith.constant 0 : index
    %c0_10 = arith.constant 0 : index
    %11 = vector.load %arg5[%c0_9, %c0_10] : memref<1x128xf32, #tpu.memory_space<vmem>>, vector<1x128xf32>
    %12 = vector.broadcast %11 : vector<1x128xf32> to vector<512x128xf32>
    %13 = arith.addf %10, %12 : vector<512x128xf32>
    %14 = arith.truncf %13 : vector<512x128xf32> to vector<512x128xbf16>
    %c0_11 = arith.constant 0 : index
    %c0_12 = arith.constant 0 : index
    %15 = vector.load %arg6[%c0_11, %c0_12] : memref<512x128xbf16, #tpu.memory_space<vmem>>, vector<512x128xbf16>
    tpu.vector_store %arg6[%c0_11, %c0_12], %14 {strides = array<i32>} : memref<512x128xbf16, #tpu.memory_space<vmem>>, vector<512x128xbf16>,
    return
  }
  func.func @transform_0(%arg0: i32) -> (i32, i32) {
    %c0_i32 = arith.constant 0 : i32
    %c0_i32_0 = arith.constant 0 : i32
    return %arg0, %c0_i32 : i32, i32
  }
  func.func @transform_1(%arg0: i32) -> (i32, i32) {
    %c0_i32 = arith.constant 0 : i32
    %c0_i32_0 = arith.constant 0 : i32
    %c0_i32_1 = arith.constant 0 : i32
    return %c0_i32, %c0_i32_0 : i32, i32
  }
  func.func @transform_2(%arg0: i32) -> (i32, i32) {
    %c0_i32 = arith.constant 0 : i32
    %c0_i32_0 = arith.constant 0 : i32
    %c0_i32_1 = arith.constant 0 : i32
    return %c0_i32, %c0_i32_0 : i32, i32
  }
  func.func @transform_3(%arg0: i32) -> (i32, i32) {
    %c0_i32 = arith.constant 0 : i32
    %c0_i32_0 = arith.constant 0 : i32
    %c0_i32_1 = arith.constant 0 : i32
    return %c0_i32, %c0_i32_0 : i32, i32
  }
  func.func @transform_4(%arg0: i32) -> (i32, i32) {
    %c0_i32 = arith.constant 0 : i32
    %c0_i32_0 = arith.constant 0 : i32
    %c0_i32_1 = arith.constant 0 : i32
    return %c0_i32, %c0_i32_0 : i32, i32
  }
  func.func @transform_5(%arg0: i32) -> (i32, i32) {
    %c0_i32 = arith.constant 0 : i32
    %c0_i32_0 = arith.constant 0 : i32
    return %arg0, %c0_i32 : i32, i32
  }
}

</mosaic_0001>

<bundles_post_ra>
// kernel: tpu_custom_call.1
= control target key start
LH: loop header
LB: loop body
LE: loop exit
PB: predicated region body
PF: predicated region fallthrough
CT: control target
= control target key end

     0   :  { %10 = vsyncpa [#allocation3], 0  ;;  %s2420_s0 = inlined_call_operand.hbm [shape: bf16[512,128], index: 0, kind: input, shape index: {}]   ;;  %s2421_s1 = inlined_call_operand.hbm [shape: bf16[128,128], index: 1, kind: input, shape index: {}]   ;;  %s2422_s2 = inlined_call_operand.vmem [shape: f32[1,128], index: 2, kind: input, shape index: {}]   ;;  %s2423_s3 = inlined_call_operand.hbm [shape: bf16[128,128], index: 3, kind: input, shape index: {}]   ;;  %s2424_s4 = inlined_call_operand.vmem [shape: f32[1,128], index: 4, kind: input, shape index: {}]   ;;  %s2425_s5 = inlined_call_operand.hbm [shape: bf16[512,128], index: 5, kind: output, shape index: {}]  }
   0x1   :  { %11 = vsyncpa [#allocation6], 0 }
   0x2   :  { %12 = vsyncpa [#allocation4], 0  ;;  %s2222_s18 = smov [#allocation5]   ;;  %s2223_s20 = smov [#allocation2]  }
   0x3   :  { %s30_s19 = sshll.u32 %s2222_s18, 4  ;;  %s18_s21 = sshll.u32 %s2223_s20, 4  ;;  %s31_s19 = int_to_ptr.vmem [resolvable:$true] %s30_s19  ;;  %s19_s21 = int_to_ptr.vmem [resolvable:$true] %s18_s21 }
   0x4   :  { %s2144_s22 = scalar_lea.vmem %s31_s19, 1024  ;;  %p2149_p1 = scmp.lt.s32.totalorder %s31_s19, %s31_s19 }
   0x5   :  { %p2145_p0 = scmp.ne.s32.totalorder %s31_s19, %s2144_s22  ;;  %p2150_p2 = scmp.lt.s32.totalorder %s2144_s22, %s2144_s22 }
   0x7   :  { %p2151_p3 = por %p2150_p2, %p2149_p1 }
   0x9   :  { %p2152_p4 = pnand %p2151_p3, %p2145_p0 }
   0xb   :  { %2155 = shalt.err (!%p2152_p4)
}
   0xc   :  { %s2224_s23 = smov 64   ;;  %s2225_s24 = smov 4  }
   0xd   :  { %36 = dma.hbm_to_vmem [thread:$0]  %s2421_s1, 1024, %s31_s19, [#allocation6], %s2224_s23, %s2224_s23, %s2225_s24  }
   0xe   :  { %s2164_s27 = scalar_lea.vmem %s19_s21, 4096  ;;  %p2169_p6 = scmp.lt.s32.totalorder %s19_s21, %s19_s21 }
   0xf   :  { %p2165_p5 = scmp.ne.s32.totalorder %s19_s21, %s2164_s27  ;;  %p2170_p7 = scmp.lt.s32.totalorder %s2164_s27, %s2164_s27 }
  0x11   :  { %p2171_p8 = por %p2170_p7, %p2169_p6 }
  0x13   :  { %p2172_p9 = pnand %p2171_p8, %p2165_p5 }
  0x15   :  { %2175 = shalt.err (!%p2172_p9)
}
  0x16   :  { %24 = dma.hbm_to_vmem [thread:$0]  %s2420_s0, 4096, %s19_s21, [#allocation3], %s2224_s23, %s2224_s23, %s2225_s24  }
  0x17   :  { %s2226_s30 = smov [#allocation7]  }
  0x18   :  { %s44_s6 = sshll.u32 %s2226_s30, 4  ;;  %s45_s6 = int_to_ptr.vmem [resolvable:$true] %s44_s6 }
  0x19   :  { %s2184_s7 = scalar_lea.vmem %s45_s6, 1024  ;;  %p2189_p11 = scmp.lt.s32.totalorder %s45_s6, %s45_s6 }
  0x1a   :  { %p2185_p10 = scmp.ne.s32.totalorder %s45_s6, %s2184_s7  ;;  %p2190_p12 = scmp.lt.s32.totalorder %s2184_s7, %s2184_s7 }
  0x1c   :  { %p2191_p13 = por %p2190_p12, %p2189_p11 }
  0x1e   :  { %p2192_p0 = pnand %p2191_p13, %p2185_p10 }
  0x20   :  { %2195 = shalt.err (!%p2192_p0)
}
  0x21   :  { %50 = dma.hbm_to_vmem [thread:$0]  %s2423_s3, 1024, %s45_s6, [#allocation6], %s2224_s23, %s2224_s23, %s2225_s24  }
  0x22   :  { %2216 = dma.done.wait [#allocation3], 4096  }
  0x23   :  { %2217 = vsyncadd [#allocation3], 4294963200 }
  0x24   :  { %2218 = dma.done.wait [#allocation6], 2048  }
  0x25   :  { %2219 = vsyncadd [#allocation6], 4294965248  ;;  %v2088_v0 = vld [vmem:[#allocation5 + $0x38] sm:$0xff]   ;;  %v2089_v1 = vld [vmem:[#allocation5 + $0x30] sm:$0xff]  }
  0x26   :  { %1922 = vmatprep.subr.bf16.mxu0 %v2088_v0  ;;  %v2090_v2 = vld [vmem:[#allocation5 + $0x28] sm:$0xff]   ;;  %v2091_v3 = vld [vmem:[#allocation5 + $0x20] sm:$0xff]   ;;  %v2092_v5 = vld [vmem:[#allocation5 + $0x18] sm:$0xff]  }
  0x27   :  { %1923 = vmatpush3.bf16.msra.mxu0 %v2088_v0  ;;  %v2096_v4 = vld [vmem:[#allocation2] sm:$0xff]   ;;  %v2093_v6 = vld [vmem:[#allocation5 + $0x10] sm:$0xff]   ;;  %v2094_v7 = vld [vmem:[#allocation5 + $0x8] sm:$0xff]  }
  0x28   :  { %1924 = vmatprep.subr.bf16.mxu0 %v2089_v1  ;;  %1938 = vmatprep.mubr.bf16.mxu0 %v2096_v4  ;;  %v2095_v8 = vld [vmem:[#allocation5] sm:$0xff]   ;;  %v2097_v9 = vld [vmem:[#allocation2 + $0x8] sm:$0xff]   ;;  %v2098_v10 = vld [vmem:[#allocation2 + $0x10] sm:$0xff]  }
  0x29   :  { %v2099_v11 = vld [vmem:[#allocation2 + $0x18] sm:$0xff]   ;;  %v2100_v12 = vld [vmem:[#allocation2 + $0x20] sm:$0xff]   ;;  %v2129_v14 = vld [vmem:[#allocation7 + $0x30] sm:$0xff]  }
  0x2a   :  { %v2128_v13 = vld [vmem:[#allocation7 + $0x38] sm:$0xff]   ;;  %v2101_v15 = vld [vmem:[#allocation2 + $0x28] sm:$0xff]   ;;  %v2102_v17 = vld [vmem:[#allocation2 + $0x30] sm:$0xff]  }
  0x2b   :  { %1925 = vmatpush3.bf16.msra.mxu0 %v2089_v1  ;;  %2002 = vmatprep.subr.bf16.mxu1 %v2128_v13  ;;  %v2130_v16 = vld [vmem:[#allocation7 + $0x28] sm:$0xff]   ;;  %v2131_v18 = vld [vmem:[#allocation7 + $0x20] sm:$0xff]   ;;  %v2132_v19 = vld [vmem:[#allocation7 + $0x18] sm:$0xff]  }
  0x2c   :  { %1926 = vmatprep.subr.bf16.mxu0 %v2090_v2  ;;  %2003 = vmatpush3.bf16.msra.mxu1 %v2128_v13  ;;  %v2103_v20 = vld [vmem:[#allocation2 + $0x38] sm:$0xff]   ;;  %v2104_v21 = vld [vmem:[#allocation2 + $0x40] sm:$0xff]   ;;  %v2105_v22 = vld [vmem:[#allocation2 + $0x48] sm:$0xff]  }
  0x2d   :  { %2004 = vmatprep.subr.bf16.mxu1 %v2129_v14  ;;  %v2106_v23 = vld [vmem:[#allocation2 + $0x50] sm:$0xff]   ;;  %v2107_v24 = vld [vmem:[#allocation2 + $0x58] sm:$0xff]   ;;  %v2108_v25 = vld [vmem:[#allocation2 + $0x60] sm:$0xff]  }
  0x2e   :  { %v2109_v26 = vld [vmem:[#allocation2 + $0x68] sm:$0xff]   ;;  %v2110_v27 = vld [vmem:[#allocation2 + $0x70] sm:$0xff]   ;;  %v2111_v28 = vld [vmem:[#allocation2 + $0x78] sm:$0xff]  }
  0x2f   :  { %1927 = vmatpush3.bf16.msra.mxu0 %v2090_v2  ;;  %v2112_v29 = vld [vmem:[#allocation2 + $0x80] sm:$0xff]   ;;  %v2113_v30 = vld [vmem:[#allocation2 + $0x88] sm:$0xff]   ;;  %v2114_v31 = vld [vmem:[#allocation2 + $0x90] sm:$0xff]  }
  0x30   :  { %1928 = vmatprep.subr.bf16.mxu0 %v2091_v3  ;;  %2005 = vmatpush3.bf16.msra.mxu1 %v2129_v14  ;;  %v2133_v32 = vld [vmem:[#allocation7 + $0x10] sm:$0xff]   ;;  %v2115_v33 = vld [vmem:[#allocation2 + $0x98] sm:$0xff]   ;;  %v2134_v34 = vld [vmem:[#allocation7 + $0x8] sm:$0xff]  }
  0x31   :  { %2006 = vmatprep.subr.bf16.mxu1 %v2130_v16  ;;  %v2116_v35 = vld [vmem:[#allocation2 + $0xa0] sm:$0xff]   ;;  %v2117_v37 = vld [vmem:[#allocation2 + $0xa8] sm:$0xff]   ;;  %v2118_v38 = vld [vmem:[#allocation2 + $0xb0] sm:$0xff]  }
  0x32   :  { %v2135_v36 = vld [vmem:[#allocation7] sm:$0xff]   ;;  %v2119_v39 = vld [vmem:[#allocation2 + $0xb8] sm:$0xff]   ;;  %v2121_v41 = vld [vmem:[#allocation2 + $0xc8] sm:$0xff]  }
  0x33   :  { %1929 = vmatpush3.bf16.msra.mxu0 %v2091_v3  ;;  %v2120_v40 = vld [vmem:[#allocation2 + $0xc0] sm:$0xff]   ;;  %v2122_v42 = vld [vmem:[#allocation2 + $0xd0] sm:$0xff]   ;;  %v2123_v43 = vld [vmem:[#allocation2 + $0xd8] sm:$0xff]  }
  0x34   :  { %1930 = vmatprep.subr.bf16.mxu0 %v2092_v5  ;;  %2007 = vmatpush3.bf16.msra.mxu1 %v2130_v16  ;;  %v2124_v44 = vld [vmem:[#allocation2 + $0xe0] sm:$0xff]   ;;  %v2125_v45 = vld [vmem:[#allocation2 + $0xe8] sm:$0xff]   ;;  %v2126_v46 = vld [vmem:[#allocation2 + $0xf0] sm:$0xff]  }
  0x35   :  { %2008 = vmatprep.subr.bf16.mxu1 %v2131_v18  ;;  %v2127_v47 = vld [vmem:[#allocation2 + $0xf8] sm:$0xff]   ;;  %v2279_v50 = vld [vmem:[%s2422_s2] ss:$0 sm:$0xff] }
  0x37   :  { %1931 = vmatpush3.bf16.msra.mxu0 %v2092_v5 }
  0x38   :  { %1932 = vmatprep.subr.bf16.mxu0 %v2093_v6  ;;  %2009 = vmatpush3.bf16.msra.mxu1 %v2131_v18 }
  0x39   :  { %2010 = vmatprep.subr.bf16.mxu1 %v2132_v19 }
  0x3b   :  { %1933 = vmatpush3.bf16.msra.mxu0 %v2093_v6 }
  0x3c   :  { %1934 = vmatprep.subr.bf16.mxu0 %v2094_v7  ;;  %2011 = vmatpush3.bf16.msra.mxu1 %v2132_v19 }
  0x3d   :  { %2012 = vmatprep.subr.bf16.mxu1 %v2133_v32 }
  0x3f   :  { %1935 = vmatpush3.bf16.msra.mxu0 %v2094_v7 }
  0x40   :  { %1936 = vmatprep.subr.bf16.mxu0 %v2095_v8  ;;  %2013 = vmatpush3.bf16.msra.mxu1 %v2133_v32 }
  0x41   :  { %2014 = vmatprep.subr.bf16.mxu1 %v2134_v34 }
  0x43   :  { %1937 = vmatpush3.bf16.msra.mxu0 %v2095_v8 }
  0x44   :  { %2015 = vmatpush3.bf16.msra.mxu1 %v2134_v34 }
  0x45   :  { %2016 = vmatprep.subr.bf16.mxu1 %v2135_v36 }
  0x46   :  { %1939 = vmatmul.mubr.bf16.vlgmr.msra.gmra.mxu0 %v2097_v9 }
  0x47   :  { %1942 = vmatprep.mubr.bf16.mxu0 %v2098_v10 }
  0x48   :  { %2017 = vmatpush3.bf16.msra.mxu1 %v2135_v36 }
  0x4e   :  { %1943 = vmatmul.mubr.bf16.gmra.mxu0 %v2099_v11 }
  0x4f   :  { %1946 = vmatprep.mubr.bf16.mxu0 %v2100_v12 }
  0x56   :  { %1947 = vmatmul.mubr.bf16.gmra.mxu0 %v2101_v15 }
  0x57   :  { %1950 = vmatprep.mubr.bf16.mxu0 %v2102_v17 }
  0x5e   :  { %1951 = vmatmul.mubr.bf16.gmra.mxu0 %v2103_v20 }
  0x5f   :  { %1954 = vmatprep.mubr.bf16.mxu0 %v2104_v21 }
  0x66   :  { %1955 = vmatmul.mubr.bf16.gmra.mxu0 %v2105_v22 }
  0x67   :  { %1958 = vmatprep.mubr.bf16.mxu0 %v2106_v23 }
  0x6e   :  { %1959 = vmatmul.mubr.bf16.gmra.mxu0 %v2107_v24 }
  0x6f   :  { %1962 = vmatprep.mubr.bf16.mxu0 %v2108_v25 }
  0x76   :  { %1963 = vmatmul.mubr.bf16.gmra.mxu0 %v2109_v26 }
  0x77   :  { %1966 = vmatprep.mubr.bf16.mxu0 %v2110_v27 }
  0x7e   :  { %1967 = vmatmul.mubr.bf16.gmra.mxu0 %v2111_v28 }
  0x7f   :  { %1970 = vmatprep.mubr.bf16.mxu0 %v2112_v29 }
  0x86   :  { %1971 = vmatmul.mubr.bf16.gmra.mxu0 %v2113_v30 }
  0x87   :  { %1974 = vmatprep.mubr.bf16.mxu0 %v2114_v31 }
  0x8e   :  { %1975 = vmatmul.mubr.bf16.gmra.mxu0 %v2115_v33 }
  0x8f   :  { %1978 = vmatprep.mubr.bf16.mxu0 %v2116_v35 }
  0x96   :  { %1979 = vmatmul.mubr.bf16.gmra.mxu0 %v2117_v37 }
  0x97   :  { %1982 = vmatprep.mubr.bf16.mxu0 %v2118_v38 }
  0x9e   :  { %1983 = vmatmul.mubr.bf16.gmra.mxu0 %v2119_v39 }
  0x9f   :  { %1986 = vmatprep.mubr.bf16.mxu0 %v2120_v40 }
  0xa6   :  { %1987 = vmatmul.mubr.bf16.gmra.mxu0 %v2121_v41 }
  0xa7   :  { %1990 = vmatprep.mubr.bf16.mxu0 %v2122_v42 }
  0xae   :  { %1991 = vmatmul.mubr.bf16.gmra.mxu0 %v2123_v43 }
  0xaf   :  { %1994 = vmatprep.mubr.bf16.mxu0 %v2124_v44 }
  0xb6   :  { %1995 = vmatmul.mubr.bf16.gmra.mxu0 %v2125_v45 }
  0xb7   :  { %1998 = vmatprep.mubr.bf16.mxu0 %v2126_v46 }
  0xbe   :  { %1999 = vmatmul.mubr.bf16.gmra.mxu0 %v2127_v47 }
 0x106   :  { %v1940_v48 = vpop.f32.mrf.mxu0 }
 0x107   :  { %v433_v54 = vadd.f32 %v1940_v48, %v2279_v50 }
 0x108   :  { %v424_v49 = vpop.f32.mrf.mxu0 }
 0x109   :  { %v425_v52 = vadd.f32 %v2279_v50, %v424_v49  ;;  %v681_v61 = vmax.f32 %v433_v54, 0.0 }
 0x10a   :  { %v1941_v51 = vpop.f32.mrf.mxu0 }
 0x10b   :  { %v436_v53 = vadd.f32 %v1941_v51, %v2279_v50  ;;  %v679_v59 = vmax.f32 %v425_v52, 0.0 }
 0x10c   :  { %v427_v55 = vpop.f32.mrf.mxu0 }
 0x10d   :  { %v428_v56 = vadd.f32 %v2279_v50, %v427_v55  ;;  %v682_v57 = vmax.f32 %v436_v53, 0.0 }
 0x10e   :  { %v1944_v58 = vpop.f32.mrf.mxu0 }
 0x10f   :  { %v680_v60 = vmax.f32 %v428_v56, 0.0  ;;  %v744_v0 = vpack.c.bf16 %v682_v57, %v681_v61  ;;  %v449_v4 = vadd.f32 %v1944_v58, %v2279_v50 }
 0x110   :  { %v440_v62 = vpop.f32.mrf.mxu0 }
 0x111   :  { %v743_v63 = vpack.c.bf16 %v680_v60, %v679_v59  ;;  %v441_v2 = vadd.f32 %v2279_v50, %v440_v62  ;;  %v685_v11 = vmax.f32 %v449_v4, 0.0 }
 0x112   :  { %v1945_v1 = vpop.f32.mrf.mxu0 }
 0x113   :  { %v452_v3 = vadd.f32 %v1945_v1, %v2279_v50  ;;  %2018 = vmatprep.mubr.bf16.mxu1 %v743_v63  ;;  %v683_v9 = vmax.f32 %v441_v2, 0.0 }
 0x114   :  { %v443_v5 = vpop.f32.mrf.mxu0  ;;  %2019 = vmatmul.mubr.bf16.vlgmr.msra.gmra.mxu1 %v744_v0 }
 0x115   :  { %v444_v6 = vadd.f32 %v2279_v50, %v443_v5  ;;  %v686_v7 = vmax.f32 %v452_v3, 0.0 }
 0x116   :  { %v1948_v8 = vpop.f32.mrf.mxu0 }
 0x117   :  { %v684_v10 = vmax.f32 %v444_v6, 0.0  ;;  %v746_v14 = vpack.c.bf16 %v686_v7, %v685_v11  ;;  %v465_v18 = vadd.f32 %v1948_v8, %v2279_v50 }
 0x118   :  { %v456_v12 = vpop.f32.mrf.mxu0 }
 0x119   :  { %v745_v13 = vpack.c.bf16 %v684_v10, %v683_v9  ;;  %v457_v16 = vadd.f32 %v2279_v50, %v456_v12  ;;  %v689_v25 = vmax.f32 %v465_v18, 0.0 }
 0x11a   :  { %v1949_v15 = vpop.f32.mrf.mxu0 }
 0x11b   :  { %v468_v17 = vadd.f32 %v1949_v15, %v2279_v50  ;;  %2022 = vmatprep.mubr.bf16.mxu1 %v745_v13  ;;  %v687_v23 = vmax.f32 %v457_v16, 0.0 }
 0x11c   :  { %v459_v19 = vpop.f32.mrf.mxu0  ;;  %2023 = vmatmul.mubr.bf16.gmra.mxu1 %v746_v14 }
 0x11d   :  { %v460_v20 = vadd.f32 %v2279_v50, %v459_v19  ;;  %v690_v21 = vmax.f32 %v468_v17, 0.0 }
 0x11e   :  { %v1952_v22 = vpop.f32.mrf.mxu0 }
 0x11f   :  { %v688_v24 = vmax.f32 %v460_v20, 0.0  ;;  %v748_v28 = vpack.c.bf16 %v690_v21, %v689_v25  ;;  %v481_v32 = vadd.f32 %v1952_v22, %v2279_v50 }
 0x120   :  { %v472_v26 = vpop.f32.mrf.mxu0 }
 0x121   :  { %v747_v27 = vpack.c.bf16 %v688_v24, %v687_v23  ;;  %v473_v30 = vadd.f32 %v2279_v50, %v472_v26  ;;  %v693_v39 = vmax.f32 %v481_v32, 0.0 }
 0x122   :  { %v1953_v29 = vpop.f32.mrf.mxu0 }
 0x123   :  { %v484_v31 = vadd.f32 %v1953_v29, %v2279_v50  ;;  %2026 = vmatprep.mubr.bf16.mxu1 %v747_v27  ;;  %v691_v37 = vmax.f32 %v473_v30, 0.0 }
 0x124   :  { %v475_v33 = vpop.f32.mrf.mxu0  ;;  %2027 = vmatmul.mubr.bf16.gmra.mxu1 %v748_v28 }
 0x125   :  { %v476_v34 = vadd.f32 %v2279_v50, %v475_v33  ;;  %v694_v35 = vmax.f32 %v484_v31, 0.0 }
 0x126   :  { %v1956_v36 = vpop.f32.mrf.mxu0 }
 0x127   :  { %v692_v38 = vmax.f32 %v476_v34, 0.0  ;;  %v750_v42 = vpack.c.bf16 %v694_v35, %v693_v39  ;;  %v497_v46 = vadd.f32 %v1956_v36, %v2279_v50 }
 0x128   :  { %v488_v40 = vpop.f32.mrf.mxu0 }
 0x129   :  { %v749_v41 = vpack.c.bf16 %v692_v38, %v691_v37  ;;  %v489_v44 = vadd.f32 %v2279_v50, %v488_v40  ;;  %v697_v54 = vmax.f32 %v497_v46, 0.0 }
 0x12a   :  { %v1957_v43 = vpop.f32.mrf.mxu0 }
 0x12b   :  { %v500_v45 = vadd.f32 %v1957_v43, %v2279_v50  ;;  %2030 = vmatprep.mubr.bf16.mxu1 %v749_v41  ;;  %v695_v52 = vmax.f32 %v489_v44, 0.0 }
 0x12c   :  { %v491_v47 = vpop.f32.mrf.mxu0  ;;  %2031 = vmatmul.mubr.bf16.gmra.mxu1 %v750_v42 }
 0x12d   :  { %v492_v48 = vadd.f32 %v2279_v50, %v491_v47  ;;  %v698_v49 = vmax.f32 %v500_v45, 0.0 }
 0x12e   :  { %v1960_v51 = vpop.f32.mrf.mxu0 }
 0x12f   :  { %v696_v53 = vmax.f32 %v492_v48, 0.0  ;;  %v752_v57 = vpack.c.bf16 %v698_v49, %v697_v54  ;;  %v513_v61 = vadd.f32 %v1960_v51, %v2279_v50 }
 0x130   :  { %v504_v55 = vpop.f32.mrf.mxu0 }
 0x131   :  { %v751_v56 = vpack.c.bf16 %v696_v53, %v695_v52  ;;  %v505_v59 = vadd.f32 %v2279_v50, %v504_v55  ;;  %v701_v4 = vmax.f32 %v513_v61, 0.0 }
 0x132   :  { %v1961_v58 = vpop.f32.mrf.mxu0 }
 0x133   :  { %v516_v60 = vadd.f32 %v1961_v58, %v2279_v50  ;;  %2034 = vmatprep.mubr.bf16.mxu1 %v751_v56  ;;  %v699_v2 = vmax.f32 %v505_v59, 0.0 }
 0x134   :  { %v507_v62 = vpop.f32.mrf.mxu0  ;;  %2035 = vmatmul.mubr.bf16.gmra.mxu1 %v752_v57 }
 0x135   :  { %v508_v63 = vadd.f32 %v2279_v50, %v507_v62  ;;  %v702_v0 = vmax.f32 %v516_v60, 0.0 }
 0x136   :  { %v1964_v1 = vpop.f32.mrf.mxu0 }
 0x137   :  { %v700_v3 = vmax.f32 %v508_v63, 0.0  ;;  %v754_v7 = vpack.c.bf16 %v702_v0, %v701_v4  ;;  %v529_v11 = vadd.f32 %v1964_v1, %v2279_v50 }
 0x138   :  { %v520_v5 = vpop.f32.mrf.mxu0 }
 0x139   :  { %v753_v6 = vpack.c.bf16 %v700_v3, %v699_v2  ;;  %v521_v9 = vadd.f32 %v2279_v50, %v520_v5  ;;  %v705_v18 = vmax.f32 %v529_v11, 0.0 }
 0x13a   :  { %v1965_v8 = vpop.f32.mrf.mxu0 }
 0x13b   :  { %v532_v10 = vadd.f32 %v1965_v8, %v2279_v50  ;;  %2038 = vmatprep.mubr.bf16.mxu1 %v753_v6  ;;  %v703_v16 = vmax.f32 %v521_v9, 0.0 }
 0x13c   :  { %v523_v12 = vpop.f32.mrf.mxu0  ;;  %2039 = vmatmul.mubr.bf16.gmra.mxu1 %v754_v7 }
 0x13d   :  { %v524_v13 = vadd.f32 %v2279_v50, %v523_v12  ;;  %v706_v14 = vmax.f32 %v532_v10, 0.0 }
 0x13e   :  { %v1968_v15 = vpop.f32.mrf.mxu0 }
 0x13f   :  { %v704_v17 = vmax.f32 %v524_v13, 0.0  ;;  %v756_v21 = vpack.c.bf16 %v706_v14, %v705_v18  ;;  %v545_v25 = vadd.f32 %v1968_v15, %v2279_v50 }
 0x140   :  { %v536_v19 = vpop.f32.mrf.mxu0 }
 0x141   :  { %v755_v20 = vpack.c.bf16 %v704_v17, %v703_v16  ;;  %v537_v23 = vadd.f32 %v2279_v50, %v536_v19  ;;  %v709_v32 = vmax.f32 %v545_v25, 0.0 }
 0x142   :  { %v1969_v22 = vpop.f32.mrf.mxu0 }
 0x143   :  { %v548_v24 = vadd.f32 %v1969_v22, %v2279_v50  ;;  %2042 = vmatprep.mubr.bf16.mxu1 %v755_v20  ;;  %v707_v30 = vmax.f32 %v537_v23, 0.0 }
 0x144   :  { %v539_v26 = vpop.f32.mrf.mxu0  ;;  %2043 = vmatmul.mubr.bf16.gmra.mxu1 %v756_v21 }
 0x145   :  { %v540_v27 = vadd.f32 %v2279_v50, %v539_v26  ;;  %v710_v28 = vmax.f32 %v548_v24, 0.0 }
 0x146   :  { %v1972_v29 = vpop.f32.mrf.mxu0 }
 0x147   :  { %v708_v31 = vmax.f32 %v540_v27, 0.0  ;;  %v758_v35 = vpack.c.bf16 %v710_v28, %v709_v32  ;;  %v561_v39 = vadd.f32 %v1972_v29, %v2279_v50 }
 0x148   :  { %v552_v33 = vpop.f32.mrf.mxu0 }
 0x149   :  { %v757_v34 = vpack.c.bf16 %v708_v31, %v707_v30  ;;  %v553_v37 = vadd.f32 %v2279_v50, %v552_v33  ;;  %v713_v46 = vmax.f32 %v561_v39, 0.0 }
 0x14a   :  { %v1973_v36 = vpop.f32.mrf.mxu0 }
 0x14b   :  { %v564_v38 = vadd.f32 %v1973_v36, %v2279_v50  ;;  %2046 = vmatprep.mubr.bf16.mxu1 %v757_v34  ;;  %v711_v44 = vmax.f32 %v553_v37, 0.0 }
 0x14c   :  { %v555_v40 = vpop.f32.mrf.mxu0  ;;  %2047 = vmatmul.mubr.bf16.gmra.mxu1 %v758_v35 }
 0x14d   :  { %v556_v41 = vadd.f32 %v2279_v50, %v555_v40  ;;  %v714_v42 = vmax.f32 %v564_v38, 0.0 }
 0x14e   :  { %v1976_v43 = vpop.f32.mrf.mxu0 }
 0x14f   :  { %v712_v45 = vmax.f32 %v556_v41, 0.0  ;;  %v760_v49 = vpack.c.bf16 %v714_v42, %v713_v46  ;;  %v577_v54 = vadd.f32 %v1976_v43, %v2279_v50 }
 0x150   :  { %v568_v47 = vpop.f32.mrf.mxu0 }
 0x151   :  { %v759_v48 = vpack.c.bf16 %v712_v45, %v711_v44  ;;  %v569_v52 = vadd.f32 %v2279_v50, %v568_v47  ;;  %v717_v61 = vmax.f32 %v577_v54, 0.0 }
 0x152   :  { %v1977_v51 = vpop.f32.mrf.mxu0 }
 0x153   :  { %v580_v53 = vadd.f32 %v1977_v51, %v2279_v50  ;;  %2050 = vmatprep.mubr.bf16.mxu1 %v759_v48  ;;  %v715_v59 = vmax.f32 %v569_v52, 0.0 }
 0x154   :  { %v571_v55 = vpop.f32.mrf.mxu0  ;;  %2051 = vmatmul.mubr.bf16.gmra.mxu1 %v760_v49 }
 0x155   :  { %v572_v56 = vadd.f32 %v2279_v50, %v571_v55  ;;  %v718_v57 = vmax.f32 %v580_v53, 0.0 }
 0x156   :  { %v1980_v58 = vpop.f32.mrf.mxu0 }
 0x157   :  { %v716_v60 = vmax.f32 %v572_v56, 0.0  ;;  %v762_v0 = vpack.c.bf16 %v718_v57, %v717_v61  ;;  %v593_v4 = vadd.f32 %v1980_v58, %v2279_v50 }
 0x158   :  { %v584_v62 = vpop.f32.mrf.mxu0 }
 0x159   :  { %v761_v63 = vpack.c.bf16 %v716_v60, %v715_v59  ;;  %v585_v2 = vadd.f32 %v2279_v50, %v584_v62  ;;  %v721_v11 = vmax.f32 %v593_v4, 0.0 }
 0x15a   :  { %v1981_v1 = vpop.f32.mrf.mxu0 }
 0x15b   :  { %v596_v3 = vadd.f32 %v1981_v1, %v2279_v50  ;;  %2054 = vmatprep.mubr.bf16.mxu1 %v761_v63  ;;  %v719_v9 = vmax.f32 %v585_v2, 0.0 }
 0x15c   :  { %v587_v5 = vpop.f32.mrf.mxu0  ;;  %2055 = vmatmul.mubr.bf16.gmra.mxu1 %v762_v0 }
 0x15d   :  { %v588_v6 = vadd.f32 %v2279_v50, %v587_v5  ;;  %v722_v7 = vmax.f32 %v596_v3, 0.0 }
 0x15e   :  { %v1984_v8 = vpop.f32.mrf.mxu0 }
 0x15f   :  { %v720_v10 = vmax.f32 %v588_v6, 0.0  ;;  %v764_v14 = vpack.c.bf16 %v722_v7, %v721_v11  ;;  %v609_v18 = vadd.f32 %v1984_v8, %v2279_v50 }
 0x160   :  { %v600_v12 = vpop.f32.mrf.mxu0 }
 0x161   :  { %v763_v13 = vpack.c.bf16 %v720_v10, %v719_v9  ;;  %v601_v16 = vadd.f32 %v2279_v50, %v600_v12  ;;  %v725_v25 = vmax.f32 %v609_v18, 0.0 }
 0x162   :  { %v1985_v15 = vpop.f32.mrf.mxu0 }
 0x163   :  { %v612_v17 = vadd.f32 %v1985_v15, %v2279_v50  ;;  %2058 = vmatprep.mubr.bf16.mxu1 %v763_v13  ;;  %v723_v23 = vmax.f32 %v601_v16, 0.0 }
 0x164   :  { %v603_v19 = vpop.f32.mrf.mxu0  ;;  %2059 = vmatmul.mubr.bf16.gmra.mxu1 %v764_v14 }
 0x165   :  { %v604_v20 = vadd.f32 %v2279_v50, %v603_v19  ;;  %v726_v21 = vmax.f32 %v612_v17, 0.0 }
 0x166   :  { %v1988_v22 = vpop.f32.mrf.mxu0 }
 0x167   :  { %v724_v24 = vmax.f32 %v604_v20, 0.0  ;;  %v766_v28 = vpack.c.bf16 %v726_v21, %v725_v25  ;;  %v625_v32 = vadd.f32 %v1988_v22, %v2279_v50  ;;  %v2348_v21 = vld [vmem:[%s2424_s4] ss:$0 sm:$0xff]  ;;  %s2227_s4 = smov [#allocation8]  }
 0x168   :  { %v616_v26 = vpop.f32.mrf.mxu0  ;;  %s1460_s10 = sshll.u32 %s2227_s4, 4  ;;  %s1461_s10 = int_to_ptr.vmem [resolvable:$true] %s1460_s10 }
 0x169   :  { %v765_v27 = vpack.c.bf16 %v724_v24, %v723_v23  ;;  %v617_v30 = vadd.f32 %v2279_v50, %v616_v26  ;;  %v729_v39 = vmax.f32 %v625_v32, 0.0  ;;  %s2196_s11 = scalar_lea.vmem %s1461_s10, 4096  ;;  %p2201_p2 = scmp.lt.s32.totalorder %s1461_s10, %s1461_s10 }
 0x16a   :  { %v1989_v29 = vpop.f32.mrf.mxu0  ;;  %p2197_p1 = scmp.ne.s32.totalorder %s1461_s10, %s2196_s11  ;;  %p2202_p3 = scmp.lt.s32.totalorder %s2196_s11, %s2196_s11 }
 0x16b   :  { %v628_v31 = vadd.f32 %v1989_v29, %v2279_v50  ;;  %2062 = vmatprep.mubr.bf16.mxu1 %v765_v27  ;;  %v727_v37 = vmax.f32 %v617_v30, 0.0 }
 0x16c   :  { %v619_v33 = vpop.f32.mrf.mxu0  ;;  %2063 = vmatmul.mubr.bf16.gmra.mxu1 %v766_v28  ;;  %p2203_p4 = por %p2202_p3, %p2201_p2 }
 0x16d   :  { %v620_v34 = vadd.f32 %v2279_v50, %v619_v33  ;;  %v730_v35 = vmax.f32 %v628_v31, 0.0 }
 0x16e   :  { %v1992_v36 = vpop.f32.mrf.mxu0  ;;  %p2204_p5 = pnand %p2203_p4, %p2197_p1 }
 0x16f   :  { %v728_v38 = vmax.f32 %v620_v34, 0.0  ;;  %v768_v42 = vpack.c.bf16 %v730_v35, %v729_v39  ;;  %v641_v46 = vadd.f32 %v1992_v36, %v2279_v50 }
 0x170   :  { %v632_v40 = vpop.f32.mrf.mxu0 }
 0x171   :  { %v767_v41 = vpack.c.bf16 %v728_v38, %v727_v37  ;;  %v633_v44 = vadd.f32 %v2279_v50, %v632_v40  ;;  %v733_v54 = vmax.f32 %v641_v46, 0.0 }
 0x172   :  { %v1993_v43 = vpop.f32.mrf.mxu0 }
 0x173   :  { %v644_v45 = vadd.f32 %v1993_v43, %v2279_v50  ;;  %2066 = vmatprep.mubr.bf16.mxu1 %v767_v41  ;;  %v731_v52 = vmax.f32 %v633_v44, 0.0 }
 0x174   :  { %v635_v47 = vpop.f32.mrf.mxu0  ;;  %2067 = vmatmul.mubr.bf16.gmra.mxu1 %v768_v42 }
 0x175   :  { %v636_v48 = vadd.f32 %v2279_v50, %v635_v47  ;;  %v734_v49 = vmax.f32 %v644_v45, 0.0 }
 0x176   :  { %v1996_v51 = vpop.f32.mrf.mxu0 }
 0x177   :  { %v732_v53 = vmax.f32 %v636_v48, 0.0  ;;  %v770_v57 = vpack.c.bf16 %v734_v49, %v733_v54  ;;  %v657_v61 = vadd.f32 %v1996_v51, %v2279_v50 }
 0x178   :  { %v648_v55 = vpop.f32.mrf.mxu0 }
 0x179   :  { %v769_v56 = vpack.c.bf16 %v732_v53, %v731_v52  ;;  %v649_v59 = vadd.f32 %v2279_v50, %v648_v55  ;;  %v737_v4 = vmax.f32 %v657_v61, 0.0 }
 0x17a   :  { %v1997_v58 = vpop.f32.mrf.mxu0 }
 0x17b   :  { %v660_v60 = vadd.f32 %v1997_v58, %v2279_v50  ;;  %2070 = vmatprep.mubr.bf16.mxu1 %v769_v56  ;;  %v735_v2 = vmax.f32 %v649_v59, 0.0 }
 0x17c   :  { %v651_v62 = vpop.f32.mrf.mxu0  ;;  %2071 = vmatmul.mubr.bf16.gmra.mxu1 %v770_v57 }
 0x17d   :  { %v652_v63 = vadd.f32 %v2279_v50, %v651_v62  ;;  %v738_v0 = vmax.f32 %v660_v60, 0.0 }
 0x17e   :  { %v2000_v1 = vpop.f32.mrf.mxu0 }
 0x17f   :  { %v736_v3 = vmax.f32 %v652_v63, 0.0  ;;  %v772_v7 = vpack.c.bf16 %v738_v0, %v737_v4  ;;  %v673_v11 = vadd.f32 %v2000_v1, %v2279_v50 }
 0x180   :  { %v664_v5 = vpop.f32.mrf.mxu0 }
 0x181   :  { %v771_v6 = vpack.c.bf16 %v736_v3, %v735_v2  ;;  %v665_v9 = vadd.f32 %v2279_v50, %v664_v5  ;;  %v741_v17 = vmax.f32 %v673_v11, 0.0 }
 0x182   :  { %v2001_v8 = vpop.f32.mrf.mxu0 }
 0x183   :  { %v676_v10 = vadd.f32 %v2001_v8, %v2279_v50  ;;  %2074 = vmatprep.mubr.bf16.mxu1 %v771_v6  ;;  %v739_v15 = vmax.f32 %v665_v9, 0.0 }
 0x184   :  { %v667_v12 = vpop.f32.mrf.mxu0  ;;  %2075 = vmatmul.mubr.bf16.gmra.mxu1 %v772_v7 }
 0x185   :  { %v668_v13 = vadd.f32 %v2279_v50, %v667_v12  ;;  %v742_v14 = vmax.f32 %v676_v10, 0.0 }
 0x187   :  { %v740_v16 = vmax.f32 %v668_v13, 0.0  ;;  %v774_v19 = vpack.c.bf16 %v742_v14, %v741_v17 }
 0x189   :  { %v773_v18 = vpack.c.bf16 %v740_v16, %v739_v15 }
 0x18b   :  { %2078 = vmatprep.mubr.bf16.mxu1 %v773_v18 }
 0x18c   :  { %2079 = vmatmul.mubr.bf16.gmra.mxu1 %v774_v19 }
 0x1d4   :  { %v2020_v20 = vpop.f32.mrf.mxu1 }
 0x1d5   :  { %v889_v24 = vadd.f32 %v2020_v20, %v2348_v21 }
 0x1d6   :  { %v880_v22 = vpop.f32.mrf.mxu1 }
 0x1d7   :  { %v881_v26 = vadd.f32 %v2348_v21, %v880_v22 }
 0x1d8   :  { %v2021_v23 = vpop.f32.mrf.mxu1 }
 0x1d9   :  { %v892_v50 = vadd.f32 %v2021_v23, %v2348_v21 }
 0x1da   :  { %v883_v25 = vpop.f32.mrf.mxu1 }
 0x1db   :  { %v1659_v27 = vpack.c.bf16 %v892_v50, %v889_v24  ;;  %v884_v28 = vadd.f32 %v2348_v21, %v883_v25 }
 0x1dc   :  { %v2024_v29 = vpop.f32.mrf.mxu1 }
 0x1dd   :  { %1811 = vst [vmem:[#allocation8 + $0x8] sm:$0xff] %v1659_v27   ;;  %v1654_v30 = vpack.c.bf16 %v884_v28, %v881_v26  ;;  %v905_v33 = vadd.f32 %v2024_v29, %v2348_v21 }
 0x1de   :  { %v896_v31 = vpop.f32.mrf.mxu1 }
 0x1df   :  { %1655 = vst [vmem:[#allocation8] sm:$0xff] %v1654_v30   ;;  %v897_v36 = vadd.f32 %v2348_v21, %v896_v31 }
 0x1e0   :  { %v2025_v32 = vpop.f32.mrf.mxu1 }
 0x1e1   :  { %v908_v34 = vadd.f32 %v2025_v32, %v2348_v21 }
 0x1e2   :  { %v899_v35 = vpop.f32.mrf.mxu1 }
 0x1e3   :  { %v1669_v37 = vpack.c.bf16 %v908_v34, %v905_v33  ;;  %v900_v38 = vadd.f32 %v2348_v21, %v899_v35 }
 0x1e4   :  { %v2028_v39 = vpop.f32.mrf.mxu1 }
 0x1e5   :  { %1813 = vst [vmem:[#allocation8 + $0x18] sm:$0xff] %v1669_v37   ;;  %v1664_v40 = vpack.c.bf16 %v900_v38, %v897_v36  ;;  %v921_v43 = vadd.f32 %v2028_v39, %v2348_v21 }
 0x1e6   :  { %v912_v41 = vpop.f32.mrf.mxu1 }
 0x1e7   :  { %1812 = vst [vmem:[#allocation8 + $0x10] sm:$0xff] %v1664_v40   ;;  %v913_v46 = vadd.f32 %v2348_v21, %v912_v41 }
 0x1e8   :  { %v2029_v42 = vpop.f32.mrf.mxu1 }
 0x1e9   :  { %v924_v44 = vadd.f32 %v2029_v42, %v2348_v21 }
 0x1ea   :  { %v915_v45 = vpop.f32.mrf.mxu1 }
 0x1eb   :  { %v1679_v47 = vpack.c.bf16 %v924_v44, %v921_v43  ;;  %v916_v48 = vadd.f32 %v2348_v21, %v915_v45 }
 0x1ec   :  { %v2032_v49 = vpop.f32.mrf.mxu1 }
 0x1ed   :  { %1815 = vst [vmem:[#allocation8 + $0x28] sm:$0xff] %v1679_v47   ;;  %v1674_v51 = vpack.c.bf16 %v916_v48, %v913_v46  ;;  %v937_v54 = vadd.f32 %v2032_v49, %v2348_v21 }
 0x1ee   :  { %v928_v52 = vpop.f32.mrf.mxu1 }
 0x1ef   :  { %1814 = vst [vmem:[#allocation8 + $0x20] sm:$0xff] %v1674_v51   ;;  %v929_v57 = vadd.f32 %v2348_v21, %v928_v52 }
 0x1f0   :  { %v2033_v53 = vpop.f32.mrf.mxu1 }
 0x1f1   :  { %v940_v55 = vadd.f32 %v2033_v53, %v2348_v21 }
 0x1f2   :  { %v931_v56 = vpop.f32.mrf.mxu1 }
 0x1f3   :  { %v1689_v58 = vpack.c.bf16 %v940_v55, %v937_v54  ;;  %v932_v59 = vadd.f32 %v2348_v21, %v931_v56 }
 0x1f4   :  { %v2036_v60 = vpop.f32.mrf.mxu1 }
 0x1f5   :  { %1817 = vst [vmem:[#allocation8 + $0x38] sm:$0xff] %v1689_v58   ;;  %v1684_v61 = vpack.c.bf16 %v932_v59, %v929_v57  ;;  %v953_v0 = vadd.f32 %v2036_v60, %v2348_v21 }
 0x1f6   :  { %v944_v62 = vpop.f32.mrf.mxu1 }
 0x1f7   :  { %1816 = vst [vmem:[#allocation8 + $0x30] sm:$0xff] %v1684_v61   ;;  %v945_v3 = vadd.f32 %v2348_v21, %v944_v62 }
 0x1f8   :  { %v2037_v63 = vpop.f32.mrf.mxu1 }
 0x1f9   :  { %v956_v1 = vadd.f32 %v2037_v63, %v2348_v21 }
 0x1fa   :  { %v947_v2 = vpop.f32.mrf.mxu1 }
 0x1fb   :  { %v1699_v4 = vpack.c.bf16 %v956_v1, %v953_v0  ;;  %v948_v5 = vadd.f32 %v2348_v21, %v947_v2 }
 0x1fc   :  { %v2040_v6 = vpop.f32.mrf.mxu1 }
 0x1fd   :  { %1819 = vst [vmem:[#allocation8 + $0x48] sm:$0xff] %v1699_v4   ;;  %v1694_v7 = vpack.c.bf16 %v948_v5, %v945_v3  ;;  %v969_v10 = vadd.f32 %v2040_v6, %v2348_v21 }
 0x1fe   :  { %v960_v8 = vpop.f32.mrf.mxu1 }
 0x1ff   :  { %1818 = vst [vmem:[#allocation8 + $0x40] sm:$0xff] %v1694_v7   ;;  %v961_v13 = vadd.f32 %v2348_v21, %v960_v8 }
 0x200   :  { %v2041_v9 = vpop.f32.mrf.mxu1 }
 0x201   :  { %v972_v11 = vadd.f32 %v2041_v9, %v2348_v21 }
 0x202   :  { %v963_v12 = vpop.f32.mrf.mxu1 }
 0x203   :  { %v1709_v14 = vpack.c.bf16 %v972_v11, %v969_v10  ;;  %v964_v15 = vadd.f32 %v2348_v21, %v963_v12 }
 0x204   :  { %v2044_v16 = vpop.f32.mrf.mxu1 }
 0x205   :  { %1821 = vst [vmem:[#allocation8 + $0x58] sm:$0xff] %v1709_v14   ;;  %v1704_v17 = vpack.c.bf16 %v964_v15, %v961_v13  ;;  %v985_v20 = vadd.f32 %v2044_v16, %v2348_v21 }
 0x206   :  { %v976_v18 = vpop.f32.mrf.mxu1 }
 0x207   :  { %1820 = vst [vmem:[#allocation8 + $0x50] sm:$0xff] %v1704_v17   ;;  %v977_v24 = vadd.f32 %v2348_v21, %v976_v18 }
 0x208   :  { %v2045_v19 = vpop.f32.mrf.mxu1 }
 0x209   :  { %v988_v22 = vadd.f32 %v2045_v19, %v2348_v21 }
 0x20a   :  { %v979_v23 = vpop.f32.mrf.mxu1 }
 0x20b   :  { %v1719_v50 = vpack.c.bf16 %v988_v22, %v985_v20  ;;  %v980_v25 = vadd.f32 %v2348_v21, %v979_v23 }
 0x20c   :  { %v2048_v26 = vpop.f32.mrf.mxu1 }
 0x20d   :  { %1823 = vst [vmem:[#allocation8 + $0x68] sm:$0xff] %v1719_v50   ;;  %v1714_v27 = vpack.c.bf16 %v980_v25, %v977_v24  ;;  %v1001_v30 = vadd.f32 %v2048_v26, %v2348_v21 }
 0x20e   :  { %v992_v28 = vpop.f32.mrf.mxu1 }
 0x20f   :  { %1822 = vst [vmem:[#allocation8 + $0x60] sm:$0xff] %v1714_v27   ;;  %v993_v33 = vadd.f32 %v2348_v21, %v992_v28 }
 0x210   :  { %v2049_v29 = vpop.f32.mrf.mxu1 }
 0x211   :  { %v1004_v31 = vadd.f32 %v2049_v29, %v2348_v21 }
 0x212   :  { %v995_v32 = vpop.f32.mrf.mxu1 }
 0x213   :  { %v1729_v34 = vpack.c.bf16 %v1004_v31, %v1001_v30  ;;  %v996_v35 = vadd.f32 %v2348_v21, %v995_v32 }
 0x214   :  { %v2052_v36 = vpop.f32.mrf.mxu1 }
 0x215   :  { %1825 = vst [vmem:[#allocation8 + $0x78] sm:$0xff] %v1729_v34   ;;  %v1724_v37 = vpack.c.bf16 %v996_v35, %v993_v33  ;;  %v1017_v40 = vadd.f32 %v2052_v36, %v2348_v21 }
 0x216   :  { %v1008_v38 = vpop.f32.mrf.mxu1 }
 0x217   :  { %1824 = vst [vmem:[#allocation8 + $0x70] sm:$0xff] %v1724_v37   ;;  %v1009_v43 = vadd.f32 %v2348_v21, %v1008_v38 }
 0x218   :  { %v2053_v39 = vpop.f32.mrf.mxu1 }
 0x219   :  { %v1020_v41 = vadd.f32 %v2053_v39, %v2348_v21 }
 0x21a   :  { %v1011_v42 = vpop.f32.mrf.mxu1 }
 0x21b   :  { %v1739_v44 = vpack.c.bf16 %v1020_v41, %v1017_v40  ;;  %v1012_v45 = vadd.f32 %v2348_v21, %v1011_v42 }
 0x21c   :  { %v2056_v46 = vpop.f32.mrf.mxu1 }
 0x21d   :  { %1827 = vst [vmem:[#allocation8 + $0x88] sm:$0xff] %v1739_v44   ;;  %v1734_v47 = vpack.c.bf16 %v1012_v45, %v1009_v43  ;;  %v1033_v51 = vadd.f32 %v2056_v46, %v2348_v21 }
 0x21e   :  { %v1024_v48 = vpop.f32.mrf.mxu1 }
 0x21f   :  { %1826 = vst [vmem:[#allocation8 + $0x80] sm:$0xff] %v1734_v47   ;;  %v1025_v54 = vadd.f32 %v2348_v21, %v1024_v48 }
 0x220   :  { %v2057_v49 = vpop.f32.mrf.mxu1 }
 0x221   :  { %v1036_v52 = vadd.f32 %v2057_v49, %v2348_v21 }
 0x222   :  { %v1027_v53 = vpop.f32.mrf.mxu1 }
 0x223   :  { %v1749_v55 = vpack.c.bf16 %v1036_v52, %v1033_v51  ;;  %v1028_v56 = vadd.f32 %v2348_v21, %v1027_v53 }
 0x224   :  { %v2060_v57 = vpop.f32.mrf.mxu1 }
 0x225   :  { %1829 = vst [vmem:[#allocation8 + $0x98] sm:$0xff] %v1749_v55   ;;  %v1744_v58 = vpack.c.bf16 %v1028_v56, %v1025_v54  ;;  %v1049_v61 = vadd.f32 %v2060_v57, %v2348_v21 }
 0x226   :  { %v1040_v59 = vpop.f32.mrf.mxu1 }
 0x227   :  { %1828 = vst [vmem:[#allocation8 + $0x90] sm:$0xff] %v1744_v58   ;;  %v1041_v0 = vadd.f32 %v2348_v21, %v1040_v59 }
 0x228   :  { %v2061_v60 = vpop.f32.mrf.mxu1 }
 0x229   :  { %v1052_v62 = vadd.f32 %v2061_v60, %v2348_v21 }
 0x22a   :  { %v1043_v63 = vpop.f32.mrf.mxu1 }
 0x22b   :  { %v1759_v1 = vpack.c.bf16 %v1052_v62, %v1049_v61  ;;  %v1044_v2 = vadd.f32 %v2348_v21, %v1043_v63 }
 0x22c   :  { %v2064_v3 = vpop.f32.mrf.mxu1 }
 0x22d   :  { %1831 = vst [vmem:[#allocation8 + $0xa8] sm:$0xff] %v1759_v1   ;;  %v1754_v4 = vpack.c.bf16 %v1044_v2, %v1041_v0  ;;  %v1065_v7 = vadd.f32 %v2064_v3, %v2348_v21 }
 0x22e   :  { %v1056_v5 = vpop.f32.mrf.mxu1 }
 0x22f   :  { %1830 = vst [vmem:[#allocation8 + $0xa0] sm:$0xff] %v1754_v4   ;;  %v1057_v10 = vadd.f32 %v2348_v21, %v1056_v5 }
 0x230   :  { %v2065_v6 = vpop.f32.mrf.mxu1 }
 0x231   :  { %v1068_v8 = vadd.f32 %v2065_v6, %v2348_v21 }
 0x232   :  { %v1059_v9 = vpop.f32.mrf.mxu1 }
 0x233   :  { %v1769_v11 = vpack.c.bf16 %v1068_v8, %v1065_v7  ;;  %v1060_v12 = vadd.f32 %v2348_v21, %v1059_v9 }
 0x234   :  { %v2068_v13 = vpop.f32.mrf.mxu1 }
 0x235   :  { %1833 = vst [vmem:[#allocation8 + $0xb8] sm:$0xff] %v1769_v11   ;;  %v1764_v14 = vpack.c.bf16 %v1060_v12, %v1057_v10  ;;  %v1081_v17 = vadd.f32 %v2068_v13, %v2348_v21 }
 0x236   :  { %v1072_v15 = vpop.f32.mrf.mxu1 }
 0x237   :  { %1832 = vst [vmem:[#allocation8 + $0xb0] sm:$0xff] %v1764_v14   ;;  %v1073_v20 = vadd.f32 %v2348_v21, %v1072_v15 }
 0x238   :  { %v2069_v16 = vpop.f32.mrf.mxu1 }
 0x239   :  { %v1084_v18 = vadd.f32 %v2069_v16, %v2348_v21 }
 0x23a   :  { %v1075_v19 = vpop.f32.mrf.mxu1 }
 0x23b   :  { %v1779_v22 = vpack.c.bf16 %v1084_v18, %v1081_v17  ;;  %v1076_v23 = vadd.f32 %v2348_v21, %v1075_v19 }
 0x23c   :  { %v2072_v24 = vpop.f32.mrf.mxu1 }
 0x23d   :  { %1835 = vst [vmem:[#allocation8 + $0xc8] sm:$0xff] %v1779_v22   ;;  %v1774_v50 = vpack.c.bf16 %v1076_v23, %v1073_v20  ;;  %v1097_v27 = vadd.f32 %v2072_v24, %v2348_v21 }
 0x23e   :  { %v1088_v25 = vpop.f32.mrf.mxu1 }
 0x23f   :  { %1834 = vst [vmem:[#allocation8 + $0xc0] sm:$0xff] %v1774_v50   ;;  %v1089_v30 = vadd.f32 %v2348_v21, %v1088_v25 }
 0x240   :  { %v2073_v26 = vpop.f32.mrf.mxu1 }
 0x241   :  { %v1100_v28 = vadd.f32 %v2073_v26, %v2348_v21 }
 0x242   :  { %v1091_v29 = vpop.f32.mrf.mxu1 }
 0x243   :  { %v1789_v31 = vpack.c.bf16 %v1100_v28, %v1097_v27  ;;  %v1092_v32 = vadd.f32 %v2348_v21, %v1091_v29 }
 0x244   :  { %v2076_v33 = vpop.f32.mrf.mxu1 }
 0x245   :  { %1837 = vst [vmem:[#allocation8 + $0xd8] sm:$0xff] %v1789_v31   ;;  %v1784_v34 = vpack.c.bf16 %v1092_v32, %v1089_v30  ;;  %v1113_v37 = vadd.f32 %v2076_v33, %v2348_v21 }
 0x246   :  { %v1104_v35 = vpop.f32.mrf.mxu1 }
 0x247   :  { %1836 = vst [vmem:[#allocation8 + $0xd0] sm:$0xff] %v1784_v34   ;;  %v1105_v40 = vadd.f32 %v2348_v21, %v1104_v35 }
 0x248   :  { %v2077_v36 = vpop.f32.mrf.mxu1 }
 0x249   :  { %v1116_v38 = vadd.f32 %v2077_v36, %v2348_v21 }
 0x24a   :  { %v1107_v39 = vpop.f32.mrf.mxu1 }
 0x24b   :  { %v1799_v41 = vpack.c.bf16 %v1116_v38, %v1113_v37  ;;  %v1108_v42 = vadd.f32 %v2348_v21, %v1107_v39 }
 0x24c   :  { %v2080_v43 = vpop.f32.mrf.mxu1 }
 0x24d   :  { %1839 = vst [vmem:[#allocation8 + $0xe8] sm:$0xff] %v1799_v41   ;;  %v1794_v44 = vpack.c.bf16 %v1108_v42, %v1105_v40  ;;  %v1129_v47 = vadd.f32 %v2080_v43, %v2348_v21 }
 0x24e   :  { %v1120_v45 = vpop.f32.mrf.mxu1 }
 0x24f   :  { %1838 = vst [vmem:[#allocation8 + $0xe0] sm:$0xff] %v1794_v44   ;;  %v1121_v51 = vadd.f32 %v2348_v21, %v1120_v45 }
 0x250   :  { %v2081_v46 = vpop.f32.mrf.mxu1 }
 0x251   :  { %v1132_v48 = vadd.f32 %v2081_v46, %v2348_v21 }
 0x252   :  { %v1123_v49 = vpop.f32.mrf.mxu1 }
 0x253   :  { %v1809_v52 = vpack.c.bf16 %v1132_v48, %v1129_v47  ;;  %v1124_v53 = vadd.f32 %v2348_v21, %v1123_v49 }
 0x255   :  { %1841 = vst [vmem:[#allocation8 + $0xf8] sm:$0xff] %v1809_v52   ;;  %v1804_v54 = vpack.c.bf16 %v1124_v53, %v1121_v51 }
 0x257   :  { %1840 = vst [vmem:[#allocation8 + $0xf0] sm:$0xff] %v1804_v54  }
 0x258   :  { %2207 = shalt.err (!%p2204_p5)
}
 0x259   :  { %1466 = dma.vmem_to_hbm [thread:$0]  %s1461_s10, 4096, %s2425_s5, [#allocation4], %s2224_s23, %s2224_s23, %s2225_s24  }
 0x25a   :  { %2220 = dma.done.wait [#allocation4], 4096  }
 0x25b   :  { %2221 = vsyncadd [#allocation4], 4294963200 }
 0x25c   :  { %1470 = vsyncpa [#allocation3], 1 }
 0x25d   :  { %1471 = vsyncpa [#allocation6], 1 }
 0x25e   :  { %1472 = vsyncpa [#allocation4], 1 }

</bundles_post_ra>
